<compile_context>
chip_gen: v7x
topology: tpu7x:2x2x1
jax: 0.10.0
libtpu: 0.0.40
codegen_flags: <defaults>
</compile_context>

<pallas_src>
import math

import jax
import jax.numpy as jnp
from jax import lax
from jax.experimental import pallas as pl
from jax.experimental.pallas import tpu as pltpu


_INV_SQRT2 = 1.0 / math.sqrt(2.0)
_TANH_C = math.sqrt(2.0 / math.pi)


def _round_up(x, m):
    return ((x + m - 1) // m) * m


def _gelu(h, approximate):
    if approximate:
        # tanh approximation: exp/tanh goes to the EUP slot (essentially free).
        return 0.5 * h * (1.0 + jnp.tanh(_TANH_C * (h + 0.044715 * h * h * h)))
    # exact erf GELU (matches torch ACT2FN["gelu"])
    return 0.5 * h * (1.0 + lax.erf(h * _INV_SQRT2))


def _make_kernel(approximate_gelu, accumulate_in_output):
    """FFN kernel body. If accumulate_in_output, o_ref (f32) is the accumulator."""

    def kernel(x_ref, w1_ref, b1_ref, w2_ref, b2_ref, o_ref, *scratch):
        acc_ref = o_ref if accumulate_in_output else scratch[0]
        k = pl.program_id(1)

        @pl.when(k == 0)
        def _():
            acc_ref[...] = jnp.zeros_like(acc_ref)

        # Cast the activation tile to the MXU compute dtype in-kernel (no extra HBM
        # round-trip in the wrapper).
        x = x_ref[...]
        if x.dtype != w1_ref.dtype:
            x = x.astype(w1_ref.dtype)

        # First matmul (N-tiled over I); bias + GELU in f32.
        h = jnp.dot(x, w1_ref[...], preferred_element_type=jnp.float32)
        h = h + b1_ref[...]
        h = _gelu(h, approximate_gelu)
        # intermediate_dropout: identity (eval mode)

        # Second matmul: K-reduction over I, accumulated in f32.
        acc_ref[...] += jnp.dot(h.astype(w2_ref.dtype), w2_ref[...],
                                preferred_element_type=jnp.float32)

        @pl.when(k == pl.num_programs(1) - 1)
        def _():
            # output bias; output_dropout: identity (eval mode)
            if accumulate_in_output:
                o_ref[...] = o_ref[...] + b2_ref[...]
            else:
                o_ref[...] = (acc_ref[...] + b2_ref[...]).astype(o_ref.dtype)

    return kernel


def _device_config():
    """Per-generation default tiles and the chip's VMEM capacity (bytes)."""
    kind = ""
    try:
        kind = jax.devices()[0].device_kind.lower()
    except Exception:
        pass
    vmem_cap = None
    try:
        vmem_cap = int(pltpu.get_tpu_info().vmem_capacity_bytes)
    except Exception:
        pass
    if ("v7" in kind) or ("7x" in kind):
        # 64 MiB VMEM, ~310 FLOP/byte crossover -> TM=512 already compute-bound.
        return 512, 512, (vmem_cap or (64 << 20))
    if "v6" in kind:
        # 128 MiB VMEM, ~650-700 FLOP/byte crossover -> big row tiles.
        return 1024, 1024, (vmem_cap or (128 << 20))
    if "v5" in kind:
        # ~240 FLOP/byte crossover.
        return 512, 1024, (vmem_cap or (128 << 20))
    # Unknown device: conservative (v7x-safe) defaults.
    return 512, 512, (vmem_cap or (64 << 20))


def _choose_ti(I, target):
    """Pick a lane-aligned intermediate tile and the (possibly padded) I it divides."""
    target = max(128, (target // 128) * 128)
    ipad128 = _round_up(I, 128)
    if ipad128 <= target:
        return ipad128, ipad128
    # Largest multiple of 128 <= target that divides the 128-padded I (no extra pad).
    t = target
    while t >= 128:
        if ipad128 % t == 0:
            return t, ipad128
        t -= 128
    # Awkward I: pad the intermediate dim up to a multiple of the target tile.
    # Zero-padded W1 columns / b1 entries / W2 rows contribute exactly zero.
    return target, _round_up(ipad128, target)


def feed_forward(hidden_states, w1, b1, w2, b2, *,
                 compute_dtype=jnp.bfloat16,
                 approximate_gelu=False,
                 tm=None, ti=None):
    """Fused FFN forward.

    hidden_states: (B, S, H); w1: (H, I); b1: (I,); w2: (I, H); b2: (H,).
    compute_dtype: MXU input dtype (default bf16; pass jnp.float32 for an exact
      reference path - slow multi-pass MXU). For best performance pre-cast w1/w2 to
      compute_dtype once outside this call. Bias add, GELU and accumulation are
      always f32; output keeps the input dtype.
    """
    B, S, H = hidden_states.shape
    I = w1.shape[1]
    M = B * S
    out_dtype = hidden_states.dtype
    if compute_dtype is None:
        compute_dtype = hidden_states.dtype

    tm_def, ti_def, vmem_cap = _device_config()
    tm = tm if tm is not None else tm_def
    ti = ti if ti is not None else ti_def

    # ---- one-time weight prep (callers should pre-cast to avoid per-call casts) ----
    if w1.dtype != compute_dtype:
        w1 = w1.astype(compute_dtype)
    if w2.dtype != compute_dtype:
        w2 = w2.astype(compute_dtype)

    TI, Ipad = _choose_ti(I, ti)
    if Ipad != I:
        w1 = jnp.pad(w1, ((0, 0), (0, Ipad - I)))
        b1 = jnp.pad(b1, (0, Ipad - I))
        w2 = jnp.pad(w2, ((0, Ipad - I), (0, 0)))
    b1_2d = b1.astype(jnp.float32).reshape(1, Ipad)
    b2_2d = b2.astype(jnp.float32).reshape(1, H)

    # ---- row tiling ----
    M8 = _round_up(M, 8)
    TM = min(tm, M8)
    if M8 >= 16:
        # Guarantee >= 2 row tiles so v7x megacore can shard the "parallel" axis.
        TM = min(TM, _round_up(-(-M8 // 2), 8))
    TM = max(8, _round_up(TM, 8))

    # ---- VMEM budget check (shrink TI first, then TM) ----
    x_itm = jnp.dtype(hidden_states.dtype).itemsize
    w_itm = jnp.dtype(compute_dtype).itemsize
    out_itm = jnp.dtype(out_dtype).itemsize
    use_scratch_acc = jnp.dtype(out_dtype) != jnp.dtype(jnp.float32)

    def per_step_bytes(tm_, ti_):
        b = 2 * (tm_ * H * x_itm          # x tile (double-buffered)
                 + H * ti_ * w_itm        # W1 tile
                 + ti_ * H * w_itm        # W2 tile
                 + 4 * ti_ + 4 * H        # b1 / b2 tiles (f32)
                 + tm_ * H * out_itm)     # output tile
        if use_scratch_acc:
            b += tm_ * H * 4              # resident f32 accumulator
        return b

    budget = max(16 << 20, vmem_cap - (8 << 20))
    while (per_step_bytes(TM, TI) > budget and TI >= 256
           and (TI // 2) % 128 == 0 and Ipad % (TI // 2) == 0):
        TI //= 2
    while per_step_bytes(TM, TI) > budget and TM > 128:
        TM = max(128, _round_up(TM // 2, 8))

    Mpad = _round_up(M, TM)
    x2d = hidden_states.reshape(M, H)
    if Mpad != M:
        x2d = jnp.pad(x2d, ((0, Mpad - M), (0, 0)))

    m_tiles = Mpad // TM
    grid = (m_tiles, Ipad // TI)

    # Accurate per-step estimate + headroom, capped below the chip's physical VMEM.
    vmem_limit = int(min(max(per_step_bytes(TM, TI) + (4 << 20), 32 << 20),
                         vmem_cap - (4 << 20)))

    cost = pl.CostEstimate(
        flops=4 * M * H * I,                       # two matmuls
        transcendentals=M * I,                     # activation per intermediate element
        bytes_accessed=(x_itm * Mpad * H
                        + m_tiles * w_itm * 2 * H * Ipad   # weights re-streamed per M tile
                        + 4 * (Ipad + H)
                        + out_itm * Mpad * H),
    )

    kernel = _make_kernel(approximate_gelu, accumulate_in_output=not use_scratch_acc)
    scratch_shapes = [pltpu.VMEM((TM, H), jnp.float32)] if use_scratch_acc else []

    out2d = pl.pallas_call(
        kernel,
        out_shape=jax.ShapeDtypeStruct((Mpad, H), out_dtype),
        grid_spec=pltpu.PrefetchScalarGridSpec(
            num_scalar_prefetch=0,
            grid=grid,
            in_specs=[
                pl.BlockSpec((TM, H), lambda i, k: (i, 0)),   # x row tile
                pl.BlockSpec((H, TI), lambda i, k: (0, k)),   # W1 N-tile
                pl.BlockSpec((1, TI), lambda i, k: (0, k)),   # b1 tile
                pl.BlockSpec((TI, H), lambda i, k: (k, 0)),   # W2 K-tile
                pl.BlockSpec((1, H), lambda i, k: (0, 0)),    # b2 (resident)
            ],
            out_specs=pl.BlockSpec((TM, H), lambda i, k: (i, 0)),
            scratch_shapes=scratch_shapes,
        ),
        compiler_params=pltpu.CompilerParams(
            dimension_semantics=("parallel", "arbitrary"),
            vmem_limit_bytes=vmem_limit,
        ),
        cost_estimate=cost,
    )(x2d, w1, b1_2d, w2, b2_2d)

    if Mpad != M:
        out2d = out2d[:M]
    return out2d.reshape(B, S, H)


if __name__ == "__main__":
    # Small shapes consistent with the module's forward.
    batch, seq, hidden_size, intermediate_size = 2, 8, 32, 128

    key = jax.random.PRNGKey(0)
    kx, kw1, kb1, kw2, kb2 = jax.random.split(key, 5)

    x = jax.random.normal(kx, (batch, seq, hidden_size), dtype=jnp.float32)

    # nn.Linear(hidden, intermediate): weight stored transposed as (hidden, intermediate)
    # so the kernel computes x @ W1 directly.
    bound1 = 1.0 / math.sqrt(hidden_size)
    w1 = jax.random.uniform(kw1, (hidden_size, intermediate_size),
                            minval=-bound1, maxval=bound1, dtype=jnp.float32)
    b1 = jax.random.uniform(kb1, (intermediate_size,),
                            minval=-bound1, maxval=bound1, dtype=jnp.float32)

    bound2 = 1.0 / math.sqrt(intermediate_size)
    w2 = jax.random.uniform(kw2, (intermediate_size, hidden_size),
                            minval=-bound2, maxval=bound2, dtype=jnp.float32)
    b2 = jax.random.uniform(kb2, (hidden_size,),
                            minval=-bound2, maxval=bound2, dtype=jnp.float32)

    # Reference in plain JAX (dropout is identity in eval mode), exact erf GELU.
    h_ref = x.reshape(-1, hidden_size) @ w1 + b1
    h_ref = 0.5 * h_ref * (1.0 + lax.erf(h_ref / math.sqrt(2.0)))
    y_ref = (h_ref @ w2 + b2).reshape(batch, seq, hidden_size)

    # 1) f32 reference path: tight tolerance (exactness check).
    out_f32 = jax.block_until_ready(
        feed_forward(x, w1, b1, w2, b2, compute_dtype=jnp.float32))
    assert jnp.allclose(out_f32, y_ref, atol=1e-5, rtol=1e-5), "f32 mismatch vs reference"

    # 2) Default bf16 MXU path (f32 output accumulated directly in the output block).
    #    Weights pre-cast ONCE outside the call (the recommended production pattern).
    w1_bf16 = w1.astype(jnp.bfloat16)
    w2_bf16 = w2.astype(jnp.bfloat16)
    out_bf16 = jax.block_until_ready(feed_forward(x, w1_bf16, b1, w2_bf16, b2))
    assert jnp.allclose(out_bf16, y_ref, atol=5e-2, rtol=5e-2), "bf16 mismatch vs reference"

    # 3) bf16 activations + bf16 weights (exercises the scratch-accumulator variant).
    x_bf16 = x.astype(jnp.bfloat16)
    out_bf16_io = jax.block_until_ready(feed_forward(x_bf16, w1_bf16, b1, w2_bf16, b2))
    assert jnp.allclose(out_bf16_io.astype(jnp.float32), y_ref, atol=1e-1, rtol=1e-1), \
        "bf16 I/O mismatch vs reference"

    print("KERNEL_OK")
</pallas_src>

<mosaic_0001>
module attributes {stable_mosaic.version = 11 : i64} {
  func.func @kernel(%arg0: i32, %arg1: i32, %arg2: memref<8x32xf32, #tpu.memory_space<vmem>>, %arg3: memref<32x128xf32, #tpu.memory_space<vmem>>, %arg4: memref<1x128xf32, #tpu.memory_space<vmem>>, %arg5: memref<128x32xf32, #tpu.memory_space<vmem>>, %arg6: memref<1x32xf32, #tpu.memory_space<vmem>>, %arg7: memref<8x32xf32, #tpu.memory_space<vmem>>) attributes {dimension_semantics = [#tpu.dimension_semantics<parallel>, #tpu.dimension_semantics<arbitrary>], iteration_bounds = array<i64: 2, 1>, scalar_prefetch = 0 : i64, scratch_operands = 0 : i64, tpu.core_type = #tpu.core_type<tc>, window_params = [{transform_indices = @transform_0, window_bounds = array<i64: 8, 32>}, {transform_indices = @transform_1, window_bounds = array<i64: 32, 128>}, {transform_indices = @transform_2, window_bounds = array<i64: 1, 128>}, {transform_indices = @transform_3, window_bounds = array<i64: 128, 32>}, {pipeline_mode = #tpu.pipeline_mode<synchronous>, transform_indices = @transform_4, window_bounds = array<i64: 1, 32>}, {transform_indices = @transform_5, window_bounds = array<i64: 8, 32>}]} {
    %c0_i32 = arith.constant 0 : i32
    %0 = arith.cmpi eq, %arg1, %c0_i32 : i32
    %1 = arith.extui %0 : i1 to i32
    %c0_i32_0 = arith.constant 0 : i32
    %2 = arith.cmpi ne, %1, %c0_i32_0 : i32
    scf.if %2 {
      %cst_18 = arith.constant 0.000000e+00 : f32
      %25 = vector.broadcast %cst_18 : f32 to vector<8x32xf32>
      %c0_19 = arith.constant 0 : index
      %c0_20 = arith.constant 0 : index
      %26 = vector.load %arg7[%c0_19, %c0_20] : memref<8x32xf32, #tpu.memory_space<vmem>>, vector<8x32xf32>
      tpu.vector_store %arg7[%c0_19, %c0_20], %25 {strides = array<i32>} : memref<8x32xf32, #tpu.memory_space<vmem>>, vector<8x32xf32>,
    } else {
    }
    %c0 = arith.constant 0 : index
    %c0_1 = arith.constant 0 : index
    %3 = vector.load %arg2[%c0, %c0_1] : memref<8x32xf32, #tpu.memory_space<vmem>>, vector<8x32xf32>
    %c0_2 = arith.constant 0 : index
    %c0_3 = arith.constant 0 : index
    %4 = vector.load %arg3[%c0_2, %c0_3] : memref<32x128xf32, #tpu.memory_space<vmem>>, vector<32x128xf32>
    %cst = arith.constant dense<0.000000e+00> : vector<8x128xf32>
    %5 = tpu.matmul %3, %4, %cst {dimension_numbers = #tpu.dot_dimension_numbers<[1], [0], [0], [1], [0, 0, 1, 1], [], []>} : vector<8x32xf32>, vector<32x128xf32>, vector<8x128xf32> -> vector<8x128xf32>
    %c0_4 = arith.constant 0 : index
    %c0_5 = arith.constant 0 : index
    %6 = vector.load %arg4[%c0_4, %c0_5] : memref<1x128xf32, #tpu.memory_space<vmem>>, vector<1x128xf32>
    %7 = vector.broadcast %6 : vector<1x128xf32> to vector<8x128xf32>
    %8 = arith.addf %5, %7 : vector<8x128xf32>
    %cst_6 = arith.constant 5.000000e-01 : f32
    %9 = vector.broadcast %cst_6 : f32 to vector<8x128xf32>
    %10 = arith.mulf %9, %8 : vector<8x128xf32>
    %cst_7 = arith.constant 0.707106769 : f32
    %11 = vector.broadcast %cst_7 : f32 to vector<8x128xf32>
    %12 = arith.mulf %8, %11 : vector<8x128xf32>
    %13 = math.erf %12 : vector<8x128xf32>
    %cst_8 = arith.constant 1.000000e+00 : f32
    %14 = vector.broadcast %cst_8 : f32 to vector<8x128xf32>
    %15 = arith.addf %14, %13 : vector<8x128xf32>
    %16 = arith.mulf %10, %15 : vector<8x128xf32>
    %c0_9 = arith.constant 0 : index
    %c0_10 = arith.constant 0 : index
    %17 = vector.load %arg7[%c0_9, %c0_10] : memref<8x32xf32, #tpu.memory_space<vmem>>, vector<8x32xf32>
    %c0_11 = arith.constant 0 : index
    %c0_12 = arith.constant 0 : index
    %18 = vector.load %arg5[%c0_11, %c0_12] : memref<128x32xf32, #tpu.memory_space<vmem>>, vector<128x32xf32>
    %cst_13 = arith.constant dense<0.000000e+00> : vector<8x32xf32>
    %19 = tpu.matmul %16, %18, %cst_13 {dimension_numbers = #tpu.dot_dimension_numbers<[1], [0], [0], [1], [0, 0, 1, 1], [], []>} : vector<8x128xf32>, vector<128x32xf32>, vector<8x32xf32> -> vector<8x32xf32>
    %20 = arith.addf %17, %19 : vector<8x32xf32>
    %c0_14 = arith.constant 0 : index
    %c0_15 = arith.constant 0 : index
    %21 = vector.load %arg7[%c0_14, %c0_15] : memref<8x32xf32, #tpu.memory_space<vmem>>, vector<8x32xf32>
    tpu.vector_store %arg7[%c0_14, %c0_15], %20 {strides = array<i32>} : memref<8x32xf32, #tpu.memory_space<vmem>>, vector<8x32xf32>,
    %c0_i32_16 = arith.constant 0 : i32
    %22 = arith.cmpi eq, %arg1, %c0_i32_16 : i32
    %23 = arith.extui %22 : i1 to i32
    %c0_i32_17 = arith.constant 0 : i32
    %24 = arith.cmpi ne, %23, %c0_i32_17 : i32
    scf.if %24 {
      %c0_18 = arith.constant 0 : index
      %c0_19 = arith.constant 0 : index
      %25 = vector.load %arg7[%c0_18, %c0_19] : memref<8x32xf32, #tpu.memory_space<vmem>>, vector<8x32xf32>
      %c0_20 = arith.constant 0 : index
      %c0_21 = arith.constant 0 : index
      %26 = vector.load %arg6[%c0_20, %c0_21] : memref<1x32xf32, #tpu.memory_space<vmem>>, vector<1x32xf32>
      %27 = vector.broadcast %26 : vector<1x32xf32> to vector<8x32xf32>
      %28 = arith.addf %25, %27 : vector<8x32xf32>
      %c0_22 = arith.constant 0 : index
      %c0_23 = arith.constant 0 : index
      %29 = vector.load %arg7[%c0_22, %c0_23] : memref<8x32xf32, #tpu.memory_space<vmem>>, vector<8x32xf32>
      tpu.vector_store %arg7[%c0_22, %c0_23], %28 {strides = array<i32>} : memref<8x32xf32, #tpu.memory_space<vmem>>, vector<8x32xf32>,
    } else {
    }
    return
  }
  func.func @transform_0(%arg0: i32, %arg1: i32) -> (i32, i32) {
    %c0_i32 = arith.constant 0 : i32
    %c0_i32_0 = arith.constant 0 : i32
    return %arg0, %c0_i32 : i32, i32
  }
  func.func @transform_1(%arg0: i32, %arg1: i32) -> (i32, i32) {
    %c0_i32 = arith.constant 0 : i32
    %c0_i32_0 = arith.constant 0 : i32
    return %c0_i32, %arg1 : i32, i32
  }
  func.func @transform_2(%arg0: i32, %arg1: i32) -> (i32, i32) {
    %c0_i32 = arith.constant 0 : i32
    %c0_i32_0 = arith.constant 0 : i32
    return %c0_i32, %arg1 : i32, i32
  }
  func.func @transform_3(%arg0: i32, %arg1: i32) -> (i32, i32) {
    %c0_i32 = arith.constant 0 : i32
    %c0_i32_0 = arith.constant 0 : i32
    return %arg1, %c0_i32 : i32, i32
  }
  func.func @transform_4(%arg0: i32, %arg1: i32) -> (i32, i32) {
    %c0_i32 = arith.constant 0 : i32
    %c0_i32_0 = arith.constant 0 : i32
    %c0_i32_1 = arith.constant 0 : i32
    return %c0_i32, %c0_i32_0 : i32, i32
  }
  func.func @transform_5(%arg0: i32, %arg1: i32) -> (i32, i32) {
    %c0_i32 = arith.constant 0 : i32
    %c0_i32_0 = arith.constant 0 : i32
    return %arg0, %c0_i32 : i32, i32
  }
}

</mosaic_0001>

<bundles_post_ra>
// kernel: tpu_custom_call.1
= control target key start
LH: loop header
LB: loop body
LE: loop exit
PB: predicated region body
PF: predicated region fallthrough
CT: control target
= control target key end

     0   :  { %10 = vsyncpa [#allocation3], 0  ;;  %s1090_s0 = inlined_call_operand.vmem [shape: f32[16,32], index: 0, kind: input, shape index: {}]   ;;  %s1091_s1 = inlined_call_operand.vmem [shape: f32[32,128], index: 1, kind: input, shape index: {}]   ;;  %s1092_s2 = inlined_call_operand.vmem [shape: f32[1,128], index: 2, kind: input, shape index: {}]   ;;  %s1093_s3 = inlined_call_operand.vmem [shape: f32[128,32], index: 3, kind: input, shape index: {}]   ;;  %s1094_s4 = inlined_call_operand.vmem [shape: f32[1,32], index: 4, kind: input, shape index: {}]   ;;  %s1095_s5 = inlined_call_operand.hbm [shape: f32[16,32], index: 5, kind: output, shape index: {}]  }
   0x1   :  { %12 = vsyncpa [#allocation3 + $0x1], 0  ;;  %s896_s18 = smov 0   ;;  %s898_s19 = smov 0  }
   0x2   :  { %s900_s20 = smov 0   ;;  %s902_s21 = smov 0  }
   0x3   :  { %s904_s22 = smov 0   ;;  %s906_s23 = smov 0  }
   0x4 LB: > { %s607_s24 = sadd.s32 4294967295, %s860_s23   ;;  %s608_s25 = sadd.s32 4294967294, %s860_s23   ;;  %s860_s23 = sphi %s906_s23, %s18_s23   ;;  %s856_s22 = sphi %s904_s22, %s1102_s22   ;;  %s852_s21 = sphi %s902_s21, %s1101_s21   ;;  %s848_s20 = sphi %s900_s20, %s1100_s20   ;;  %s844_s19 = sphi %s898_s19, %s1099_s19   ;;  %s840_s18 = sphi %s896_s18, %s1098_s18  }
   0x5   : > { %s30_s26 = sadd.s32 1, %s856_s22  ;;  %s162_s27 = sadd.s32 1, %s848_s20 }
   0x6   : > { %p32_p0 = scmp.ge.s32.totalorder %s30_s26, 2  ;;  %p172_p1 = scmp.ne.s32.totalorder %s848_s20, %s844_s19 }
   0x7   : > { %p173_p2 = scmp.eq.s32.totalorder %s607_s24, 1  ;;  %p178_p3 = scmp.ne.s32.totalorder %s844_s19, %s840_s18 }
   0x8   : > { %s1104_s26 = smov (%p32_p0, %s30_s26), 0  ;;  %p179_p5 = scmp.eq.s32.totalorder %s608_s25, 1 }
   0x9   : > { %p936_p4 = por %p173_p2, %p172_p1  ;;  %s159_s29 = ssub.s32 %s856_s22, %s1104_s26 }
   0xa   : > { %p614_p6 = scmp.ge.s32.totalorder %s860_s23, 1  ;;  %p160_p7 = scmp.eq.s32.totalorder %s159_s29, 0 }
   0xb   : > { %p943_p8 = por %p179_p5, %p178_p3  ;;  %p229_p9 = scmp.lt.s32.totalorder %s860_s23, 3 }
   0xc   : > { %s949_s6 = scalar_select %p160_p7, %s848_s20, %s162_s27  }
   0xd   : > { %p230_p10 = pnand %p614_p6, %p229_p9 }
   0xe   : > { %v292_v0 = vld [vmem:[%s1091_s1] sm:$0xff] (!%p230_p10)  ;;  %v293_v1 = vld [vmem:[%s1091_s1 + $0x8] sm:$0xff] (!%p230_p10)  ;;  %v294_v2 = vld [vmem:[%s1091_s1 + $0x10] sm:$0xff] (!%p230_p10)  ;;  %v862_v3 = vmov (!%p230_p10), 0.0|0.0   ;;  %vm863_vm0 = vmmov (!%p230_p10), 0   ;;  %v864_v6 = vmov (!%p230_p10), 0.0  }
   0xf   : > { %233 = sbr.rel (%p230_p10) target bundleno = 496 (0x1f0), region = 40  ;;  %692 = vmatprep.subr.bf16.mxu0 (!%p230_p10), %v862_v3  ;;  %v693_v4 = vpack.c.bf16 (!%p230_p10), %v293_v1, %v292_v0  ;;  %v295_v5 = vld [vmem:[%s1091_s1 + $0x18] sm:$0xff] (!%p230_p10)  ;;  %654 = vmatprep.mubr.msk.f32.mxu0 (!%p230_p10), %vm863_vm0, %v864_v6  ;;  %s265_s15 = sand.u32 (!%p230_p10), 1, %s844_s19   ;;  %v383_v7 = vld [vmem:[%s1093_s3] sm:$0xff] (!%p230_p10)  ;;  %v384_v8 = vld [vmem:[%s1093_s3 + $0x8] sm:$0xff] (!%p230_p10)  ;;  %vm289_vm1 = vcmask (!%p230_p10), 261120  }
  0x10   : > { %p268_p11 = scmp.lt.s32.totalorder (!%p230_p10), %s852_s21, 1  ;;  %s615_s27 = sshll.u32 (!%p230_p10), %s265_s15, 3  ;;  %698 = vmatprep.subr.bf16.mxu1 (!%p230_p10), %v862_v3  ;;  %v699_v9 = vpack.c.bf16 (!%p230_p10), %v384_v8, %v383_v7  ;;  %v385_v10 = vld [vmem:[%s1093_s3 + $0x10] sm:$0xff] (!%p230_p10)  ;;  %v386_v11 = vld [vmem:[%s1093_s3 + $0x18] sm:$0xff] (!%p230_p10)  ;;  %689 = vmatprep.mubr.msk.f32.mxu1 (!%p230_p10), %vm863_vm0, %v864_v6  ;;  %v696_v12 = vpack.c.bf16 (!%p230_p10), %v295_v5, %v294_v2  ;;  %v387_v14 = vld [vmem:[%s1093_s3 + $0x20] sm:$0xff] (!%p230_p10) }
  0x11   : > { %694 = vmatpush3.bf16.msra.mxu0 (!%p230_p10), %v693_v4  ;;  %s980_s11 = scalar_lea.vmem (!%p230_p10), [#allocation2], %s615_s27  ;;  %v702_v13 = vpack.c.bf16 (!%p230_p10), %v386_v11, %v385_v10  ;;  %v388_v15 = vld [vmem:[%s1093_s3 + $0x28] sm:$0xff] (!%p230_p10)  ;;  %v389_v18 = vld [vmem:[%s1093_s3 + $0x30] sm:$0xff] (!%p230_p10)  ;;  %v390_v19 = vld [vmem:[%s1093_s3 + $0x38] sm:$0xff] (!%p230_p10)  ;;  %s621_s25 = sshll.u32 (!%p230_p10), %s852_s21, 7 }
  0x12   : > { %695 = vmatprep.subr.bf16.mxu0 (!%p230_p10), %v862_v3  ;;  %290 = vst.msk [vmem:[%s980_s11] sm:$0xff] (!%p230_p10), %vm289_vm1, %v864_v6  ;;  %700 = vmatpush3.bf16.msra.mxu1 (!%p230_p10), %v699_v9  ;;  %v705_v17 = vpack.c.bf16 (!%p230_p10), %v388_v15, %v387_v14  ;;  %v708_v20 = vpack.c.bf16 (!%p230_p10), %v390_v19, %v389_v18  ;;  %v391_v21 = vld [vmem:[%s1093_s3 + $0x40] sm:$0xff] (!%p230_p10)  ;;  %v392_v22 = vld [vmem:[%s1093_s3 + $0x48] sm:$0xff] (!%p230_p10)  ;;  %v393_v24 = vld [vmem:[%s1093_s3 + $0x50] sm:$0xff] (!%p230_p10)  ;;  %s1039_s8 = scalar_lea.hbm (!%p230_p10), %s1095_s5, %s621_s25  ;;  %s485_s9 = scalar_lea.sflag (!%p230_p10), [#allocation3], %s265_s15 }
  0x13   : > { %701 = vmatprep.subr.bf16.mxu1 (!%p230_p10), %v862_v3  ;;  %v711_v23 = vpack.c.bf16 (!%p230_p10), %v392_v22, %v391_v21  ;;  %v394_v25 = vld [vmem:[%s1093_s3 + $0x58] sm:$0xff] (!%p230_p10)  ;;  %v395_v27 = vld [vmem:[%s1093_s3 + $0x60] sm:$0xff] (!%p230_p10)  ;;  %v396_v28 = vld [vmem:[%s1093_s3 + $0x68] sm:$0xff] (!%p230_p10) }
  0x14   : > { %v714_v26 = vpack.c.bf16 (!%p230_p10), %v394_v25, %v393_v24  ;;  %v717_v29 = vpack.c.bf16 (!%p230_p10), %v396_v28, %v395_v27  ;;  %v397_v30 = vld [vmem:[%s1093_s3 + $0x70] sm:$0xff] (!%p230_p10)  ;;  %v398_v31 = vld [vmem:[%s1093_s3 + $0x78] sm:$0xff] (!%p230_p10)  ;;  %v617_v33 = vld [vmem:[%s1092_s2] ss:$0 sm:$0xff] (!%p230_p10) }
  0x15   : > { %697 = vmatpush3.bf16.msra.mxu0 (!%p230_p10), %v696_v12  ;;  %v720_v32 = vpack.c.bf16 (!%p230_p10), %v398_v31, %v397_v30  ;;  %v619_v46 = vld [vmem:[%s1094_s4] ss:$0 sm:$0xff] (!%p230_p10) }
  0x16   : > { %s269_s10 = scalar_select %p268_p11, %s852_s21, 1  ;;  %703 = vmatpush3.bf16.msra.mxu1 %v702_v13 }
  0x17   : > { %704 = vmatprep.subr.bf16.mxu1 %v862_v3  ;;  %s865_s21 = smov [#allocation2]  }
  0x18   : > { %s616_s17 = sshll.u32 %s269_s10, 3  ;;  %s786_s12 = sshll.u32 %s865_s21, 4  ;;  %s787_s12 = int_to_ptr.vmem [resolvable:$false] %s786_s12 }
  0x19   : > { %s271_s27 = scalar_lea.vmem %s1090_s0, %s616_s17  ;;  %v382_v42 = vld [vmem:[%s980_s11] sm:$0xff]  ;;  %s788_s13 = scalar_lea.vmem %s787_s12, 256 }
  0x1a   : > { %v291_v16 = vld [vmem:[%s271_s27] sm:$0xff]  ;;  %706 = vmatpush3.bf16.msra.mxu1 %v705_v17  ;;  %s498_s27 = sshll.u32 %s980_s11, 4  ;;  %s1041_s27 = int_to_ptr.vmem [resolvable:$true] %s498_s27 }
  0x1b   : > { %655 = vmatmul.mubr.msk.f32.vlgmr.msra.gmra.mrb[0].mxu0 %vm289_vm1, %v291_v16  ;;  %707 = vmatprep.subr.bf16.mxu1 %v862_v3  ;;  %s782_s10 = scalar_lea.vmem %s1041_s27, 128  ;;  %p789_p1 = scmp.lt.s32.totalorder %s1041_s27, %s787_s12 }
  0x1c   : > { %p783_p12 = scmp.ne.s32.totalorder %s1041_s27, %s782_s10  ;;  %p790_p2 = scmp.lt.s32.totalorder %s788_s13, %s782_s10 }
  0x1e   : > { %709 = vmatpush3.bf16.msra.mxu1 %v708_v20  ;;  %p784_p13 = pnand %p783_p12, %p936_p4  ;;  %p791_p3 = por %p790_p2, %p789_p1 }
  0x1f   : > { %710 = vmatprep.subr.bf16.mxu1 %v862_v3 }
  0x20   : > { %p785_p0 = pneg %p784_p13 }
  0x22   : > { %712 = vmatpush3.bf16.msra.mxu1 %v711_v23  ;;  %p792_p5 = pnand %p791_p3, %p785_p0 }
  0x23   : > { %713 = vmatprep.subr.bf16.mxu1 %v862_v3 }
  0x26   : > { %715 = vmatpush3.bf16.msra.mxu1 %v714_v26 }
  0x27   : > { %716 = vmatprep.subr.bf16.mxu1 %v862_v3 }
  0x2a   : > { %718 = vmatpush3.bf16.msra.mxu1 %v717_v29 }
  0x2b   : > { %719 = vmatprep.subr.bf16.mxu1 %v862_v3 }
  0x2e   : > { %721 = vmatpush3.bf16.msra.mxu1 %v720_v32 }
  0xee   : > { %v373_v34 = vpop.f32.mrb[0].mxu0 }
  0xef   : > { %v374_v35 = vadd.f32 %v617_v33, %v373_v34  ;;  %v656_v36 = vpop.f32.mrb[1].mxu0 }
  0xf1   : > { %v378_v37 = vmul.f32 0.70710677, %v374_v35  ;;  %v377_v39 = vmul.f32 0.5, %v374_v35 }
  0xf3   : > { %780 = verf.f32 %v378_v37 }
  0xfd   : > { %v781_v38 = vpop.eup %780 }
  0xfe   : > { %v380_v40 = vadd.f32 1.0, %v781_v38 }
 0x100   : > { %v381_v41 = vmul.f32 %v380_v40, %v377_v39 }
 0x102   : > { %690 = vmatmul.mubr.f32.vlgmr.msra.gmra.mrb[0].mxu1 %v381_v41 }
 0x1d5   : > { %v465_v43 = vpop.f32.mrb[0].mxu1 }
 0x1d6   : > { %v469_v44 = vadd.f32 %v465_v43, %v382_v42  ;;  %v691_v45 = vpop.f32.mrb[1].mxu1 }
 0x1d8   : > { %470 = vst.msk [vmem:[%s980_s11] sm:$0xff] %vm289_vm1, %v469_v44 }
 0x1df   : > { %v474_v47 = vld [vmem:[%s980_s11] sm:$0xff] }
 0x1e0   : > { %v482_v48 = vadd.f32 %v619_v46, %v474_v47 }
 0x1e2   : > { %483 = vst.msk [vmem:[%s980_s11] sm:$0xff] %vm289_vm1, %v482_v48 }
 0x1e3   : > { %795 = shalt.err (!%p792_p5)
}
 0x1e4   : > { %s796_s15 = scalar_lea.hbm %s1039_s8, 128  ;;  %s800_s16 = scalar_lea.hbm %s1095_s5, 256 }
 0x1e5   : > { %p797_p6 = scmp.ne.s32.totalorder %s1039_s8, %s796_s15  ;;  %p801_p10 = scmp.lt.u32.totalorder %s1039_s8, %s1095_s5 }
 0x1e6   : > { %p802_p11 = scmp.lt.u32.totalorder %s800_s16, %s796_s15  ;;  %p804_p13 = scmp.lt.u32.totalorder %s796_s15, %s1039_s8 }
 0x1e7   : > { %p798_p7 = pnand %p797_p6, %p936_p4 }
 0x1e8   : > { %p803_p12 = por %p802_p11, %p801_p10 }
 0x1e9   : > { %p799_p9 = pneg %p798_p7 }
 0x1ea   : > { %p805_p0 = por %p804_p13, %p803_p12 }
 0x1ec   : > { %p806_p1 = pnand %p805_p0, %p799_p9 }
 0x1ee   : > { %809 = shalt.err (!%p806_p1)
}
 0x1ef   : > { %722 = dma.vmem_to_hbm [thread:$0]  (%p936_p4), %s1041_s27, 128, %s1039_s8, %s485_s9  }
 0x1f0 PF: > { %p728_p2 = scmp.ge.s32.totalorder %s860_s23, 2  ;;  %s510_s25 = sand.u32 1, %s840_s18  }
 0x1f1   : > { %s511_s29 = scalar_lea.sflag [#allocation3], %s510_s25 }
 0x1f2   : > { %p725_p3 = pnand %p728_p2, %p943_p8 }
 0x1f4   : > { %835 = dma.done.wait (!%p725_p3), %s511_s29, 128  }
 0x1f5   : > { %837 = vsyncadd (!%p725_p3), %s511_s29, 4294967168  ;;  %s18_s23 = sadd.s32 1, %s860_s23   ;;  %s1098_s18 = smov %s844_s19 }
 0x1f6   : > { %p15_p5 = scmp.ge.s32.totalorder %s18_s23, 4   ;;  %s1099_s19 = smov %s848_s20 }
 0x1f7   : > { %s1100_s20 = smov %s949_s6  ;;  %s1101_s21 = smov %s856_s22 }
 0x1f8   : > { %s1102_s22 = smov %s1104_s26  ;;  %17 = sbr.rel (!%p15_p5) target bundleno = 4 (0x4), region = 92 }
 0x1ff   :  { %516 = vsyncpa [#allocation3], 1 }
 0x200   :  { %518 = vsyncpa [#allocation3 + $0x1], 1 }

</bundles_post_ra>
